<compile_context>
chip_gen: v7x
topology: tpu7x:2x2x1
jax: 0.10.0
libtpu: 0.0.40
codegen_flags: <defaults>
</compile_context>

<pallas_src>
import functools
import math

import numpy as np
import jax
import jax.numpy as jnp
from jax.experimental import pallas as pl
from jax.experimental.pallas import tpu as pltpu

_VALID_ACTIVATIONS = ("relu", "leaky", "linear")
_MIB = 1024 * 1024


def _round_up(v: int, m: int) -> int:
    return ((v + m - 1) // m) * m


def _apply_activation(y, activation: str, negative_slope: float):
    if activation == "relu":
        return jnp.maximum(y, 0.0)
    if activation == "leaky":
        return jnp.where(y >= 0.0, y, negative_slope * y)
    return y  # "linear"


def _kernel_multi_k(x_ref, w_ref, o_ref, acc_ref, *, activation, negative_slope):
    """3D grid (i, j, k); reduction axis k is last. acc persists across k."""
    k = pl.program_id(2)

    @pl.when(k == 0)
    def _():
        acc_ref[...] = jnp.zeros_like(acc_ref)

    acc_ref[...] += jnp.dot(x_ref[...], w_ref[...],
                            preferred_element_type=jnp.float32)

    @pl.when(k == pl.num_programs(2) - 1)
    def _():
        y = _apply_activation(acc_ref[...], activation, negative_slope)
        o_ref[...] = y.astype(o_ref.dtype)


def _kernel_single_k(x_ref, w_ref, o_ref, *, activation, negative_slope):
    """2D grid (i, j); whole K in one tile -> no accumulator round trip."""
    y = jnp.dot(x_ref[...], w_ref[...], preferred_element_type=jnp.float32)
    o_ref[...] = _apply_activation(y, activation, negative_slope).astype(o_ref.dtype)


def _vmem_limit_bytes() -> int:
    try:
        cap = pltpu.get_tpu_info().vmem_capacity_bytes
    except Exception:
        cap = 128 * _MIB
    # ~70% of physical, capped: ~45 MiB on v7x (64 MiB/TC), ~90 MiB on v5e/v6e.
    return min(int(cap * 0.7), 96 * _MIB)


def linear_activation(x: jax.Array, weight: jax.Array, activation: str = "relu",
                      *, negative_slope: float = 0.1,
                      compute_dtype=jnp.bfloat16,
                      tm: int = 512, tn: int = 512, tk: int = 1024) -> jax.Array:
    """Fused y = activation(x @ weight.T).

    x:      (..., Cin)
    weight: (Cout, Cin)  -- torch.nn.Linear.weight layout.
    compute_dtype: MXU operand dtype (default bf16; None => x.dtype, exact).
    Returns (..., Cout) in x.dtype (accumulation always f32).
    """
    if activation not in _VALID_ACTIVATIONS:
        raise ValueError(f"unknown activation: {activation}")

    *lead, Cin = x.shape
    Cout, Cin_w = weight.shape
    assert Cin == Cin_w, "in_channels mismatch"
    out_dtype = x.dtype
    B = int(math.prod(lead)) if lead else 1
    x2 = x.reshape(B, Cin)

    cdt = x.dtype if compute_dtype is None else np.dtype(compute_dtype)
    in_item = np.dtype(cdt).itemsize
    out_item = np.dtype(out_dtype).itemsize
    sub = 8 * max(1, 4 // in_item)      # packed sublane multiple: 8/16/32

    # Minimal alignment padding only (not tile multiples).
    Mp = _round_up(B, sub)
    Np = _round_up(Cout, 128)
    Kp0 = _round_up(Cin, 128)

    # Clamp tiles to the aligned problem size.
    tm = max(sub, min(_round_up(tm, sub), Mp))
    tn = max(128, min(_round_up(tn, 128), Np))
    tk = max(128, min(_round_up(tk, 128), Kp0))

    # Fit double-buffered tiles + f32 accumulator into the VMEM budget.
    vmem_limit = _vmem_limit_bytes()
    budget = int(vmem_limit * 0.85)

    def footprint(tm_, tn_, tk_):
        return (2 * tm_ * tk_ * in_item      # x  (double-buffered)
                + 2 * tk_ * tn_ * in_item    # w  (double-buffered)
                + 2 * tm_ * tn_ * out_item   # out (double-buffered)
                + tm_ * tn_ * 4)             # f32 accumulator scratch

    while footprint(tm, tn, tk) > budget:
        if tk > 512:
            tk = max(128, _round_up(tk // 2, 128))
        elif tn > 256:
            tn = max(128, _round_up(tn // 2, 128))
        elif tm > 2 * sub:
            tm = max(sub, _round_up(tm // 2, sub))
        elif tk > 128:
            tk = max(128, _round_up(tk // 2, 128))
        elif tn > 128:
            tn = max(128, _round_up(tn // 2, 128))
        else:
            break

    # Keep >= 2 (i, j) tiles when possible so both v7x TensorCores get work.
    if pl.cdiv(Mp, tm) * pl.cdiv(Np, tn) < 2:
        if Np > 128:
            tn = max(128, _round_up(pl.cdiv(Np, 2), 128))
        elif Mp > sub:
            tm = max(sub, _round_up(pl.cdiv(Mp, 2), sub))

    # Balance the reduction tile; K must be zero-padded to a tk multiple
    # (exact for the matmul, and relu/leaky/linear all map 0 -> 0).
    k_steps = pl.cdiv(Kp0, tk)
    tk = _round_up(pl.cdiv(Kp0, k_steps), 128)
    Kp = k_steps * tk

    # One-time wrapper-side layout work (fuses with the dtype cast):
    #   cast to MXU compute dtype, transpose W to canonical (Cin, Cout) RHS,
    #   zero-pad K (and M/N only to sublane/lane alignment).
    xw = x2.astype(cdt)
    wt = weight.T.astype(cdt)
    if (Mp, Kp) != (B, Cin):
        xw = jnp.pad(xw, ((0, Mp - B), (0, Kp - Cin)))
    if (Kp, Np) != (Cin, Cout):
        wt = jnp.pad(wt, ((0, Kp - Cin), (0, Np - Cout)))

    gi, gj, gk = pl.cdiv(Mp, tm), pl.cdiv(Np, tn), Kp // tk

    cost = pl.CostEstimate(
        flops=2 * Mp * Kp * Np,
        transcendentals=0,
        bytes_accessed=(Mp * Kp * gj * in_item      # x re-read per j tile
                        + Kp * Np * gi * in_item    # w re-read per i tile
                        + Mp * Np * out_item),
    )

    if gk == 1:
        kernel = functools.partial(_kernel_single_k, activation=activation,
                                   negative_slope=negative_slope)
        grid = (gi, gj)
        in_specs = [
            pl.BlockSpec((tm, tk), lambda i, j: (i, 0)),   # x tile
            pl.BlockSpec((tk, tn), lambda i, j: (0, j)),   # W.T tile (in, out)
        ]
        out_specs = pl.BlockSpec((tm, tn), lambda i, j: (i, j))
        scratch_shapes = []
        semantics = ("parallel", "parallel")
    else:
        kernel = functools.partial(_kernel_multi_k, activation=activation,
                                   negative_slope=negative_slope)
        grid = (gi, gj, gk)                                # reduction (k) last
        in_specs = [
            pl.BlockSpec((tm, tk), lambda i, j, k: (i, k)),
            pl.BlockSpec((tk, tn), lambda i, j, k: (k, j)),
        ]
        out_specs = pl.BlockSpec((tm, tn), lambda i, j, k: (i, j))
        scratch_shapes = [pltpu.VMEM((tm, tn), jnp.float32)]
        semantics = ("parallel", "parallel", "arbitrary")

    out = pl.pallas_call(
        kernel,
        out_shape=jax.ShapeDtypeStruct((Mp, Np), out_dtype),
        grid_spec=pltpu.PrefetchScalarGridSpec(
            num_scalar_prefetch=0,
            grid=grid,
            in_specs=in_specs,
            out_specs=out_specs,
            scratch_shapes=scratch_shapes,
        ),
        compiler_params=pltpu.CompilerParams(
            dimension_semantics=semantics,
            vmem_limit_bytes=vmem_limit,
        ),
        cost_estimate=cost,
    )(xw, wt)

    if (Mp, Np) != (B, Cout):
        out = out[:B, :Cout]
    return out.reshape(*lead, Cout)


if __name__ == "__main__":
    key = jax.random.PRNGKey(0)
    k_x, k_w, k_x2, k_w2 = jax.random.split(key, 4)

    # Small shapes consistent with Linear_Activation(in=32, out=16, 'relu').
    batch, in_channels, out_channels = 8, 32, 16
    x = jax.random.normal(k_x, (batch, in_channels), dtype=jnp.float32)
    bound = 1.0 / math.sqrt(in_channels)
    weight = jax.random.uniform(k_w, (out_channels, in_channels),
                                dtype=jnp.float32, minval=-bound, maxval=bound)
    y_lin_ref = x @ weight.T

    # Default path: bf16 MXU operands, f32 accumulate (perf-review default).
    y = jax.block_until_ready(linear_activation(x, weight, "relu"))
    assert y.shape == (batch, out_channels) and y.dtype == x.dtype
    assert jnp.allclose(y, jnp.maximum(y_lin_ref, 0.0), atol=5e-2, rtol=5e-2)

    # Exact f32 path (matches the PyTorch module numerics).
    y32 = jax.block_until_ready(
        linear_activation(x, weight, "relu", compute_dtype=None))
    assert jnp.allclose(y32, jnp.maximum(y_lin_ref, 0.0), atol=1e-5, rtol=1e-5)

    # Leaky / linear activation branches.
    y_leaky = jax.block_until_ready(
        linear_activation(x, weight, "leaky", compute_dtype=None))
    assert jnp.allclose(
        y_leaky, jnp.where(y_lin_ref >= 0, y_lin_ref, 0.1 * y_lin_ref),
        atol=1e-5, rtol=1e-5)
    y_id = jax.block_until_ready(
        linear_activation(x, weight, "linear", compute_dtype=None))
    assert jnp.allclose(y_id, y_lin_ref, atol=1e-5, rtol=1e-5)

    # Multi-k accumulator path (3D grid, k-resident accumulator).
    x2 = jax.random.normal(k_x2, (16, 384), dtype=jnp.float32)
    w2 = jax.random.uniform(k_w2, (256, 384), dtype=jnp.float32,
                            minval=-1.0 / math.sqrt(384), maxval=1.0 / math.sqrt(384))
    y2 = jax.block_until_ready(
        linear_activation(x2, w2, "relu", compute_dtype=None, tk=128, tn=256))
    y2_ref = jnp.maximum(x2 @ w2.T, 0.0)
    assert jnp.allclose(y2, y2_ref, atol=2e-4, rtol=2e-4)

    print("KERNEL_OK")
</pallas_src>

<mosaic_0001>
module attributes {stable_mosaic.version = 11 : i64} {
  func.func @_kernel_single_k(%arg0: i32, %arg1: i32, %arg2: memref<16x128xbf16, #tpu.memory_space<vmem>>, %arg3: memref<128x128xbf16, #tpu.memory_space<vmem>>, %arg4: memref<16x128xf32, #tpu.memory_space<vmem>>) attributes {dimension_semantics = [#tpu.dimension_semantics<parallel>, #tpu.dimension_semantics<parallel>], iteration_bounds = array<i64: 1, 1>, scalar_prefetch = 0 : i64, scratch_operands = 0 : i64, tpu.core_type = #tpu.core_type<tc>, window_params = [{transform_indices = @transform_0, window_bounds = array<i64: 16, 128>}, {transform_indices = @transform_1, window_bounds = array<i64: 128, 128>}, {transform_indices = @transform_2, window_bounds = array<i64: 16, 128>}]} {
    %c0 = arith.constant 0 : index
    %c0_0 = arith.constant 0 : index
    %0 = vector.load %arg2[%c0, %c0_0] : memref<16x128xbf16, #tpu.memory_space<vmem>>, vector<16x128xbf16>
    %c0_1 = arith.constant 0 : index
    %c0_2 = arith.constant 0 : index
    %1 = vector.load %arg3[%c0_1, %c0_2] : memref<128x128xbf16, #tpu.memory_space<vmem>>, vector<128x128xbf16>
    %cst = arith.constant dense<0.000000e+00> : vector<16x128xf32>
    %2 = tpu.matmul %0, %1, %cst {dimension_numbers = #tpu.dot_dimension_numbers<[1], [0], [0], [1], [0, 0, 1, 1], [], []>} : vector<16x128xbf16>, vector<128x128xbf16>, vector<16x128xf32> -> vector<16x128xf32>
    %cst_3 = arith.constant 0.000000e+00 : f32
    %3 = vector.broadcast %cst_3 : f32 to vector<16x128xf32>
    %4 = arith.maximumf %2, %3 : vector<16x128xf32>
    %c0_4 = arith.constant 0 : index
    %c0_5 = arith.constant 0 : index
    %5 = vector.load %arg4[%c0_4, %c0_5] : memref<16x128xf32, #tpu.memory_space<vmem>>, vector<16x128xf32>
    tpu.vector_store %arg4[%c0_4, %c0_5], %4 {strides = array<i32>} : memref<16x128xf32, #tpu.memory_space<vmem>>, vector<16x128xf32>,
    return
  }
  func.func @transform_0(%arg0: i32, %arg1: i32) -> (i32, i32) {
    %c0_i32 = arith.constant 0 : i32
    %c0_i32_0 = arith.constant 0 : i32
    return %arg0, %c0_i32 : i32, i32
  }
  func.func @transform_1(%arg0: i32, %arg1: i32) -> (i32, i32) {
    %c0_i32 = arith.constant 0 : i32
    %c0_i32_0 = arith.constant 0 : i32
    return %c0_i32, %arg1 : i32, i32
  }
  func.func @transform_2(%arg0: i32, %arg1: i32) -> (i32, i32) {
    %c0_i32 = arith.constant 0 : i32
    return %arg0, %arg1 : i32, i32
  }
}

</mosaic_0001>

<bundles_post_ra>
// kernel: tpu_custom_call.1
= control target key start
LH: loop header
LB: loop body
LE: loop exit
PB: predicated region body
PF: predicated region fallthrough
CT: control target
= control target key end

     0   :  { %7 = vsyncpa [#allocation3], 0  ;;  %s364_s0 = inlined_call_operand.hbm [shape: bf16[16,128], index: 0, kind: input, shape index: {}]   ;;  %s365_s1 = inlined_call_operand.hbm [shape: bf16[128,128], index: 1, kind: input, shape index: {}]   ;;  %s366_s2 = inlined_call_operand.hbm [shape: f32[16,128], index: 2, kind: output, shape index: {}]  }
   0x1   :  { %8 = vsyncpa [#allocation6], 0 }
   0x2   :  { %9 = vsyncpa [#allocation4], 0  ;;  %s304_s9 = smov [#allocation2]   ;;  %s232_s13 = scalar_lea.hbm %s364_s0, 128 }
   0x3   :  { %s15_s10 = sshll.u32 %s304_s9, 4  ;;  %p233_p0 = scmp.ne.s32.totalorder %s364_s0, %s232_s13  ;;  %s16_s10 = int_to_ptr.vmem [resolvable:$true] %s15_s10 }
   0x4   :  { %p236_p1 = scmp.lt.u32.totalorder %s232_s13, %s364_s0 }
   0x6   :  { %p238_p2 = pnand %p236_p1, %p233_p0 }
   0x8   :  { %241 = shalt.err (!%p238_p2)
}
   0x9   :  { %s242_s18 = scalar_lea.vmem %s16_s10, 128  ;;  %p247_p4 = scmp.lt.s32.totalorder %s16_s10, %s16_s10 }
   0xa   :  { %p243_p3 = scmp.ne.s32.totalorder %s16_s10, %s242_s18  ;;  %p248_p5 = scmp.lt.s32.totalorder %s242_s18, %s242_s18 }
   0xc   :  { %p249_p6 = por %p248_p5, %p247_p4 }
   0xe   :  { %p250_p7 = pnand %p249_p6, %p243_p3 }
  0x10   :  { %253 = shalt.err (!%p250_p7)
}
  0x11   :  { %s305_s19 = smov 64   ;;  %s306_s20 = smov 4  }
  0x12   :  { %21 = dma.hbm_to_vmem [thread:$0]  %s364_s0, 128, %s16_s10, [#allocation3], %s305_s19, %s305_s19, %s306_s20  }
  0x13   :  { %s307_s23 = smov [#allocation5]   ;;  %s254_s27 = scalar_lea.hbm %s365_s1, 1024 }
  0x14   :  { %s27_s24 = sshll.u32 %s307_s23, 4  ;;  %p255_p8 = scmp.ne.s32.totalorder %s365_s1, %s254_s27  ;;  %s28_s24 = int_to_ptr.vmem [resolvable:$true] %s27_s24 }
  0x15   :  { %p258_p9 = scmp.lt.u32.totalorder %s254_s27, %s365_s1 }
  0x17   :  { %p260_p10 = pnand %p258_p9, %p255_p8 }
  0x19   :  { %263 = shalt.err (!%p260_p10)
}
  0x1a   :  { %s264_s4 = scalar_lea.vmem %s28_s24, 1024  ;;  %p269_p12 = scmp.lt.s32.totalorder %s28_s24, %s28_s24 }
  0x1b   :  { %p265_p11 = scmp.ne.s32.totalorder %s28_s24, %s264_s4  ;;  %p270_p13 = scmp.lt.s32.totalorder %s264_s4, %s264_s4 }
  0x1d   :  { %p271_p0 = por %p270_p13, %p269_p12 }
  0x1f   :  { %p272_p1 = pnand %p271_p0, %p265_p11 }
  0x21   :  { %275 = shalt.err (!%p272_p1)
}
  0x22   :  { %33 = dma.hbm_to_vmem [thread:$0]  %s365_s1, 1024, %s28_s24, [#allocation6], %s305_s19, %s305_s19, %s306_s20  }
  0x23   :  { %298 = dma.done.wait [#allocation3], 128  }
  0x24   :  { %299 = vsyncadd [#allocation3], 4294967168 }
  0x25   :  { %300 = dma.done.wait [#allocation6], 1024  }
  0x26   :  { %301 = vsyncadd [#allocation6], 4294966272  ;;  %v308_v0 = vmov 0.0   ;;  %vm309_vm0 = vmmov 0   ;;  %v223_v1 = vld [vmem:[#allocation5] sm:$0xff]   ;;  %v224_v2 = vld [vmem:[#allocation5 + $0x8] sm:$0xff]  }
  0x27   :  { %194 = vmatprep.subr.bf16.mxu0 %v308_v0  ;;  %210 = vmatprep.mubr.msk.bf16.mxu0 %vm309_vm0, %v308_v0  ;;  %v225_v3 = vld [vmem:[#allocation5 + $0x10] sm:$0xff]   ;;  %v226_v4 = vld [vmem:[#allocation5 + $0x18] sm:$0xff]   ;;  %v227_v5 = vld [vmem:[#allocation5 + $0x20] sm:$0xff]   ;;  %s310_s1 = smov [#allocation7]  }
  0x28   :  { %195 = vmatpush3.bf16.msra.mxu0 %v223_v1  ;;  %v228_v6 = vld [vmem:[#allocation5 + $0x28] sm:$0xff]   ;;  %v229_v7 = vld [vmem:[#allocation5 + $0x30] sm:$0xff]   ;;  %v230_v8 = vld [vmem:[#allocation5 + $0x38] sm:$0xff]   ;;  %s163_s6 = sshll.u32 %s310_s1, 4  ;;  %s164_s6 = int_to_ptr.vmem [resolvable:$true] %s163_s6 }
  0x29   :  { %196 = vmatprep.subr.bf16.mxu0 %v308_v0  ;;  %v231_v9 = vld [vmem:[#allocation2] sm:$0xff]   ;;  %s276_s7 = scalar_lea.vmem %s164_s6, 256  ;;  %p281_p3 = scmp.lt.s32.totalorder %s164_s6, %s164_s6 }
  0x2a   :  { %p277_p2 = scmp.ne.s32.totalorder %s164_s6, %s276_s7  ;;  %p282_p4 = scmp.lt.s32.totalorder %s276_s7, %s276_s7 }
  0x2c   :  { %197 = vmatpush3.bf16.msra.mxu0 %v224_v2  ;;  %p283_p5 = por %p282_p4, %p281_p3 }
  0x2d   :  { %198 = vmatprep.subr.bf16.mxu0 %v308_v0 }
  0x2e   :  { %p284_p6 = pnand %p283_p5, %p277_p2 }
  0x30   :  { %199 = vmatpush3.bf16.msra.mxu0 %v225_v3 }
  0x31   :  { %200 = vmatprep.subr.bf16.mxu0 %v308_v0 }
  0x34   :  { %201 = vmatpush3.bf16.msra.mxu0 %v226_v4 }
  0x35   :  { %202 = vmatprep.subr.bf16.mxu0 %v308_v0 }
  0x38   :  { %203 = vmatpush3.bf16.msra.mxu0 %v227_v5 }
  0x39   :  { %204 = vmatprep.subr.bf16.mxu0 %v308_v0 }
  0x3c   :  { %205 = vmatpush3.bf16.msra.mxu0 %v228_v6 }
  0x3d   :  { %206 = vmatprep.subr.bf16.mxu0 %v308_v0 }
  0x40   :  { %207 = vmatpush3.bf16.msra.mxu0 %v229_v7 }
  0x41   :  { %208 = vmatprep.subr.bf16.mxu0 %v308_v0 }
  0x44   :  { %209 = vmatpush3.bf16.msra.mxu0 %v230_v8 }
  0x47   :  { %211 = vmatmul.mubr.bf16.vlgmr.msra.gmra.mrb[0].mxu0 %v231_v9 }
 0x11a   :  { %v147_v10 = vpop.f32.mrb[0].mxu0 }
 0x11b   :  { %v154_v11 = vmax.f32 %v147_v10, 0.0  ;;  %v212_v12 = vpop.f32.mrb[1].mxu0 }
 0x11c   :  { %v150_v13 = vpop.f32.mrb[2].mxu0 }
 0x11d   :  { %156 = vst [vmem:[#allocation7] sm:$0xff] %v154_v11  ;;  %v155_v14 = vmax.f32 %v150_v13, 0.0  ;;  %v213_v15 = vpop.f32.mrb[3].mxu0 }
 0x11f   :  { %157 = vst [vmem:[#allocation7 + $0x8] sm:$0xff] %v155_v14 }
 0x120   :  { %287 = shalt.err (!%p284_p6)
}
 0x121   :  { %s288_s10 = scalar_lea.hbm %s366_s2, 256 }
 0x122   :  { %p289_p7 = scmp.ne.s32.totalorder %s366_s2, %s288_s10  ;;  %p292_p8 = scmp.lt.u32.totalorder %s288_s10, %s366_s2 }
 0x124   :  { %p294_p9 = pnand %p292_p8, %p289_p7 }
 0x126   :  { %297 = shalt.err (!%p294_p9)
}
 0x127   :  { %s311_s15 = smov 128   ;;  %s312_s16 = smov 8  }
 0x128   :  { %169 = dma.vmem_to_hbm [thread:$0]  %s164_s6, 256, %s366_s2, [#allocation4], %s311_s15, %s311_s15, %s312_s16  }
 0x129   :  { %302 = dma.done.wait [#allocation4], 256  }
 0x12a   :  { %303 = vsyncadd [#allocation4], 4294967040 }
 0x12b   :  { %173 = vsyncpa [#allocation3], 1 }
 0x12c   :  { %174 = vsyncpa [#allocation6], 1 }
 0x12d   :  { %175 = vsyncpa [#allocation4], 1 }

</bundles_post_ra>
